<compile_context>
chip_gen: v7x
topology: tpu7x:2x2x1
jax: 0.10.0
libtpu: 0.0.40
codegen_flags: <defaults>
</compile_context>

<pallas_src>
import jax
import jax.numpy as jnp
from jax.experimental import pallas as pl
from jax.experimental.pallas import tpu as pltpu

CANNY_LOW = 50.0    # kept for reference; unused without hysteresis linking
CANNY_HIGH = 150.0


def _shift(img, dr, dc):
    """img[(i+dr) % H, (j+dc) % W] via XLU rolls (circular; borders masked out later)."""
    H, W = img.shape
    out = img
    if dr != 0:
        out = pltpu.roll(out, shift=(-dr) % H, axis=0)
    if dc != 0:
        out = pltpu.roll(out, shift=(-dc) % W, axis=1)
    return out


def _sobel_mag(img):
    """L1 Sobel gradient magnitude, separable form: 8 rolls total (was ~20)."""
    # column-difference pass: img[i, j+1] - img[i, j-1]
    coldiff = _shift(img, 0, 1) - _shift(img, 0, -1)
    # row-difference pass: img[i+1, j] - img[i-1, j]
    rowdiff = _shift(img, 1, 0) - _shift(img, -1, 0)
    # gx = [1,2,1] row-smoothing of coldiff
    gx = _shift(coldiff, -1, 0) + 2.0 * coldiff + _shift(coldiff, 1, 0)
    # gy = [1,2,1] column-smoothing of rowdiff
    gy = _shift(rowdiff, 0, -1) + 2.0 * rowdiff + _shift(rowdiff, 0, 1)
    return jnp.abs(gx) + jnp.abs(gy)  # cv2.Canny default L1 gradient


def custom_loss_kernel(x_ref, y_ref, out_ref):
    x = x_ref[...]
    y = y_ref[...]
    H, W = x.shape

    # mse = mean((x - y)^2), kept as a (1, 1) tile (avoid full-to-scalar reshape).
    d = x - y
    mse = jnp.sum(jnp.sum(d * d, axis=1, keepdims=True), axis=0, keepdims=True)
    mse = mse * (1.0 / (H * W))

    # Approximate cv2.Canny(img.astype(uint8), 50, 150): Sobel + strong threshold.
    # TODO(synk): full Canny (gaussian pre-blur, non-max suppression, hysteresis
    # linking of weak edges, uint8 wraparound) has no clean Pallas equivalent.
    mag_x = _sobel_mag(jnp.floor(x))  # floor ~ astype(np.uint8) truncation for [0, 256)
    mag_y = _sobel_mag(jnp.floor(y))

    # |edge(x) - edge(y)| on {0,1}-valued maps == boolean XOR of the edge maps.
    diff = (mag_x >= CANNY_HIGH) != (mag_y >= CANNY_HIGH)

    # Interior mask computed ONCE (circular rolls wrap opposite borders; cv2
    # never marks border pixels) and applied after the XOR.
    rows = jax.lax.broadcasted_iota(jnp.int32, (H, W), 0)
    cols = jax.lax.broadcasted_iota(jnp.int32, (H, W), 1)
    interior = (rows > 0) & (rows < H - 1) & (cols > 0) & (cols < W - 1)

    a3 = jnp.where(diff & interior, 1.0, 0.0)

    # Python builtin sum(a3) in the torch reference == sum over rows -> shape (W,)
    edge_loss = jnp.sum(a3, axis=0, keepdims=True)  # (1, W), lane-dense output

    # torch broadcasting: scalar mse + (W,) edge_loss -> (W,) vector loss
    out_ref[...] = mse + edge_loss


def custom_loss(x, y):
    x = x.astype(jnp.float32)
    y = y.astype(jnp.float32)
    H, W = x.shape
    out = pl.pallas_call(
        custom_loss_kernel,
        out_shape=jax.ShapeDtypeStruct((1, W), jnp.float32),
        grid=(1,),
        in_specs=[
            pl.BlockSpec((H, W), lambda i: (0, 0)),
            pl.BlockSpec((H, W), lambda i: (0, 0)),
        ],
        out_specs=pl.BlockSpec((1, W), lambda i: (0, 0)),
        compiler_params=pltpu.CompilerParams(
            dimension_semantics=("arbitrary",)),
    )(x, y)
    # shape (W,), matching the PyTorch return (scalar mse broadcast + (W,) edge_loss)
    return out[0]


if __name__ == "__main__":
    key = jax.random.PRNGKey(0)
    k1, k2 = jax.random.split(key)
    H, W = 16, 128
    # deterministic "images" in [0, 255), as cv2.Canny expects uint8-range data
    x = jax.random.uniform(k1, (H, W), jnp.float32, minval=0.0, maxval=255.0)
    y = jax.random.uniform(k2, (H, W), jnp.float32, minval=0.0, maxval=255.0)

    loss = custom_loss(x, y)
    jax.block_until_ready(loss)
    assert loss.shape == (W,) and loss.dtype == jnp.float32
    print("KERNEL_OK")
</pallas_src>

<mosaic_0001>
module attributes {stable_mosaic.version = 11 : i64} {
  func.func @custom_loss_kernel(%arg0: i32, %arg1: memref<16x128xf32, #tpu.memory_space<vmem>>, %arg2: memref<16x128xf32, #tpu.memory_space<vmem>>, %arg3: memref<1x128xf32, #tpu.memory_space<vmem>>) attributes {dimension_semantics = [#tpu.dimension_semantics<arbitrary>], iteration_bounds = array<i64: 1>, scalar_prefetch = 0 : i64, scratch_operands = 0 : i64, tpu.core_type = #tpu.core_type<tc>, window_params = [{pipeline_mode = #tpu.pipeline_mode<synchronous>, transform_indices = @transform_0, window_bounds = array<i64: 16, 128>}, {pipeline_mode = #tpu.pipeline_mode<synchronous>, transform_indices = @transform_1, window_bounds = array<i64: 16, 128>}, {pipeline_mode = #tpu.pipeline_mode<synchronous>, transform_indices = @transform_2, window_bounds = array<i64: 1, 128>}]} {
    %c0 = arith.constant 0 : index
    %c0_0 = arith.constant 0 : index
    %0 = vector.load %arg1[%c0, %c0_0] : memref<16x128xf32, #tpu.memory_space<vmem>>, vector<16x128xf32>
    %c0_1 = arith.constant 0 : index
    %c0_2 = arith.constant 0 : index
    %1 = vector.load %arg2[%c0_1, %c0_2] : memref<16x128xf32, #tpu.memory_space<vmem>>, vector<16x128xf32>
    %2 = arith.subf %0, %1 : vector<16x128xf32>
    %3 = arith.mulf %2, %2 : vector<16x128xf32>
    %cst = arith.constant dense<0.000000e+00> : vector<16xf32>
    %4 = vector.multi_reduction <add>, %3, %cst [1] : vector<16x128xf32> to vector<16xf32>
    %5 = vector.shape_cast %4 : vector<16xf32> to vector<16x1xf32>
    %cst_3 = arith.constant dense<0.000000e+00> : vector<1xf32>
    %6 = vector.multi_reduction <add>, %5, %cst_3 [0] : vector<16x1xf32> to vector<1xf32>
    %7 = vector.shape_cast %6 : vector<1xf32> to vector<1x1xf32>
    %cst_4 = arith.constant 4.8828125E-4 : f32
    %8 = vector.broadcast %cst_4 : f32 to vector<1x1xf32>
    %9 = arith.mulf %7, %8 : vector<1x1xf32>
    %10 = math.floor %0 : vector<16x128xf32>
    %c127_i32 = arith.constant 127 : i32
    %11 = tpu.dynamic_rotate %10 by %c127_i32 dim 1 : vector<16x128xf32>, i32 -> vector<16x128xf32>
    %c1_i32 = arith.constant 1 : i32
    %12 = tpu.dynamic_rotate %10 by %c1_i32 dim 1 : vector<16x128xf32>, i32 -> vector<16x128xf32>
    %13 = arith.subf %11, %12 : vector<16x128xf32>
    %c15_i32 = arith.constant 15 : i32
    %14 = tpu.dynamic_rotate %10 by %c15_i32 dim 0 : vector<16x128xf32>, i32 -> vector<16x128xf32>
    %c1_i32_5 = arith.constant 1 : i32
    %15 = tpu.dynamic_rotate %10 by %c1_i32_5 dim 0 : vector<16x128xf32>, i32 -> vector<16x128xf32>
    %16 = arith.subf %14, %15 : vector<16x128xf32>
    %c1_i32_6 = arith.constant 1 : i32
    %17 = tpu.dynamic_rotate %13 by %c1_i32_6 dim 0 : vector<16x128xf32>, i32 -> vector<16x128xf32>
    %cst_7 = arith.constant 2.000000e+00 : f32
    %18 = vector.broadcast %cst_7 : f32 to vector<16x128xf32>
    %19 = arith.mulf %18, %13 : vector<16x128xf32>
    %20 = arith.addf %17, %19 : vector<16x128xf32>
    %c15_i32_8 = arith.constant 15 : i32
    %21 = tpu.dynamic_rotate %13 by %c15_i32_8 dim 0 : vector<16x128xf32>, i32 -> vector<16x128xf32>
    %22 = arith.addf %20, %21 : vector<16x128xf32>
    %c1_i32_9 = arith.constant 1 : i32
    %23 = tpu.dynamic_rotate %16 by %c1_i32_9 dim 1 : vector<16x128xf32>, i32 -> vector<16x128xf32>
    %cst_10 = arith.constant 2.000000e+00 : f32
    %24 = vector.broadcast %cst_10 : f32 to vector<16x128xf32>
    %25 = arith.mulf %24, %16 : vector<16x128xf32>
    %26 = arith.addf %23, %25 : vector<16x128xf32>
    %c127_i32_11 = arith.constant 127 : i32
    %27 = tpu.dynamic_rotate %16 by %c127_i32_11 dim 1 : vector<16x128xf32>, i32 -> vector<16x128xf32>
    %28 = arith.addf %26, %27 : vector<16x128xf32>
    %29 = math.absf %22 : vector<16x128xf32>
    %30 = math.absf %28 : vector<16x128xf32>
    %31 = arith.addf %29, %30 : vector<16x128xf32>
    %32 = math.floor %1 : vector<16x128xf32>
    %c127_i32_12 = arith.constant 127 : i32
    %33 = tpu.dynamic_rotate %32 by %c127_i32_12 dim 1 : vector<16x128xf32>, i32 -> vector<16x128xf32>
    %c1_i32_13 = arith.constant 1 : i32
    %34 = tpu.dynamic_rotate %32 by %c1_i32_13 dim 1 : vector<16x128xf32>, i32 -> vector<16x128xf32>
    %35 = arith.subf %33, %34 : vector<16x128xf32>
    %c15_i32_14 = arith.constant 15 : i32
    %36 = tpu.dynamic_rotate %32 by %c15_i32_14 dim 0 : vector<16x128xf32>, i32 -> vector<16x128xf32>
    %c1_i32_15 = arith.constant 1 : i32
    %37 = tpu.dynamic_rotate %32 by %c1_i32_15 dim 0 : vector<16x128xf32>, i32 -> vector<16x128xf32>
    %38 = arith.subf %36, %37 : vector<16x128xf32>
    %c1_i32_16 = arith.constant 1 : i32
    %39 = tpu.dynamic_rotate %35 by %c1_i32_16 dim 0 : vector<16x128xf32>, i32 -> vector<16x128xf32>
    %cst_17 = arith.constant 2.000000e+00 : f32
    %40 = vector.broadcast %cst_17 : f32 to vector<16x128xf32>
    %41 = arith.mulf %40, %35 : vector<16x128xf32>
    %42 = arith.addf %39, %41 : vector<16x128xf32>
    %c15_i32_18 = arith.constant 15 : i32
    %43 = tpu.dynamic_rotate %35 by %c15_i32_18 dim 0 : vector<16x128xf32>, i32 -> vector<16x128xf32>
    %44 = arith.addf %42, %43 : vector<16x128xf32>
    %c1_i32_19 = arith.constant 1 : i32
    %45 = tpu.dynamic_rotate %38 by %c1_i32_19 dim 1 : vector<16x128xf32>, i32 -> vector<16x128xf32>
    %cst_20 = arith.constant 2.000000e+00 : f32
    %46 = vector.broadcast %cst_20 : f32 to vector<16x128xf32>
    %47 = arith.mulf %46, %38 : vector<16x128xf32>
    %48 = arith.addf %45, %47 : vector<16x128xf32>
    %c127_i32_21 = arith.constant 127 : i32
    %49 = tpu.dynamic_rotate %38 by %c127_i32_21 dim 1 : vector<16x128xf32>, i32 -> vector<16x128xf32>
    %50 = arith.addf %48, %49 : vector<16x128xf32>
    %51 = math.absf %44 : vector<16x128xf32>
    %52 = math.absf %50 : vector<16x128xf32>
    %53 = arith.addf %51, %52 : vector<16x128xf32>
    %cst_22 = arith.constant 1.500000e+02 : f32
    %54 = vector.broadcast %cst_22 : f32 to vector<16x128xf32>
    %55 = arith.cmpf oge, %31, %54 : vector<16x128xf32>
    %cst_23 = arith.constant 1.500000e+02 : f32
    %56 = vector.broadcast %cst_23 : f32 to vector<16x128xf32>
    %57 = arith.cmpf oge, %53, %56 : vector<16x128xf32>
    %58 = arith.xori %55, %57 : vector<16x128xi1>
    %59 = tpu.iota {dimensions = array<i32: 0>} : vector<16x128xi32>
    %60 = tpu.iota {dimensions = array<i32: 1>} : vector<16x128xi32>
    %c0_i32 = arith.constant 0 : i32
    %61 = vector.broadcast %c0_i32 : i32 to vector<16x128xi32>
    %62 = arith.cmpi sgt, %59, %61 : vector<16x128xi32>
    %c15_i32_24 = arith.constant 15 : i32
    %63 = vector.broadcast %c15_i32_24 : i32 to vector<16x128xi32>
    %64 = arith.cmpi slt, %59, %63 : vector<16x128xi32>
    %65 = arith.andi %62, %64 : vector<16x128xi1>
    %c0_i32_25 = arith.constant 0 : i32
    %66 = vector.broadcast %c0_i32_25 : i32 to vector<16x128xi32>
    %67 = arith.cmpi sgt, %60, %66 : vector<16x128xi32>
    %68 = arith.andi %65, %67 : vector<16x128xi1>
    %c127_i32_26 = arith.constant 127 : i32
    %69 = vector.broadcast %c127_i32_26 : i32 to vector<16x128xi32>
    %70 = arith.cmpi slt, %60, %69 : vector<16x128xi32>
    %71 = arith.andi %68, %70 : vector<16x128xi1>
    %72 = arith.andi %58, %71 : vector<16x128xi1>
    %cst_27 = arith.constant 1.000000e+00 : f32
    %cst_28 = arith.constant 0.000000e+00 : f32
    %73 = vector.broadcast %cst_27 : f32 to vector<16x128xf32>
    %74 = vector.broadcast %cst_28 : f32 to vector<16x128xf32>
    %75 = arith.select %72, %73, %74 : vector<16x128xi1>, vector<16x128xf32>
    %cst_29 = arith.constant dense<0.000000e+00> : vector<128xf32>
    %76 = vector.multi_reduction <add>, %75, %cst_29 [0] : vector<16x128xf32> to vector<128xf32>
    %77 = vector.shape_cast %76 : vector<128xf32> to vector<1x128xf32>
    %78 = vector.broadcast %9 : vector<1x1xf32> to vector<1x128xf32>
    %79 = arith.addf %78, %77 : vector<1x128xf32>
    %c0_30 = arith.constant 0 : index
    %c0_31 = arith.constant 0 : index
    %80 = vector.load %arg3[%c0_30, %c0_31] : memref<1x128xf32, #tpu.memory_space<vmem>>, vector<1x128xf32>
    tpu.vector_store %arg3[%c0_30, %c0_31], %79 {strides = array<i32>} : memref<1x128xf32, #tpu.memory_space<vmem>>, vector<1x128xf32>,
    return
  }
  func.func @transform_0(%arg0: i32) -> (i32, i32) {
    %c0_i32 = arith.constant 0 : i32
    %c0_i32_0 = arith.constant 0 : i32
    %c0_i32_1 = arith.constant 0 : i32
    return %c0_i32, %c0_i32_0 : i32, i32
  }
  func.func @transform_1(%arg0: i32) -> (i32, i32) {
    %c0_i32 = arith.constant 0 : i32
    %c0_i32_0 = arith.constant 0 : i32
    %c0_i32_1 = arith.constant 0 : i32
    return %c0_i32, %c0_i32_0 : i32, i32
  }
  func.func @transform_2(%arg0: i32) -> (i32, i32) {
    %c0_i32 = arith.constant 0 : i32
    %c0_i32_0 = arith.constant 0 : i32
    %c0_i32_1 = arith.constant 0 : i32
    return %c0_i32, %c0_i32_0 : i32, i32
  }
}

</mosaic_0001>

<bundles_post_ra>
// kernel: tpu_custom_call.1
= control target key start
LH: loop header
LB: loop body
LE: loop exit
PB: predicated region body
PF: predicated region fallthrough
CT: control target
= control target key end

     0   :  { %7 = vsyncpa [#allocation3], 0  ;;  %s426_s0 = inlined_call_operand.hbm [shape: f32[16,128], index: 0, kind: input, shape index: {}]   ;;  %s427_s1 = inlined_call_operand.hbm [shape: f32[16,128], index: 1, kind: input, shape index: {}]   ;;  %s428_s2 = inlined_call_operand.hbm [shape: f32[1,128], index: 2, kind: output, shape index: {}]  }
   0x1   :  { %8 = vsyncpa [#allocation6], 0 }
   0x2   :  { %9 = vsyncpa [#allocation4], 0  ;;  %s306_s9 = smov [#allocation2]   ;;  %s234_s13 = scalar_lea.hbm %s426_s0, 256 }
   0x3   :  { %s15_s10 = sshll.u32 %s306_s9, 4  ;;  %p235_p0 = scmp.ne.s32.totalorder %s426_s0, %s234_s13  ;;  %s16_s10 = int_to_ptr.vmem [resolvable:$true] %s15_s10 }
   0x4   :  { %p238_p1 = scmp.lt.u32.totalorder %s234_s13, %s426_s0 }
   0x6   :  { %p240_p2 = pnand %p238_p1, %p235_p0 }
   0x8   :  { %243 = shalt.err (!%p240_p2)
}
   0x9   :  { %s244_s18 = scalar_lea.vmem %s16_s10, 256  ;;  %p249_p4 = scmp.lt.s32.totalorder %s16_s10, %s16_s10 }
   0xa   :  { %p245_p3 = scmp.ne.s32.totalorder %s16_s10, %s244_s18  ;;  %p250_p5 = scmp.lt.s32.totalorder %s244_s18, %s244_s18 }
   0xc   :  { %p251_p6 = por %p250_p5, %p249_p4 }
   0xe   :  { %p252_p7 = pnand %p251_p6, %p245_p3 }
  0x10   :  { %255 = shalt.err (!%p252_p7)
}
  0x11   :  { %s307_s19 = smov 128   ;;  %s308_s20 = smov 8  }
  0x12   :  { %21 = dma.hbm_to_vmem [thread:$0]  %s426_s0, 256, %s16_s10, [#allocation3], %s307_s19, %s307_s19, %s308_s20  }
  0x13   :  { %s309_s23 = smov [#allocation5]   ;;  %s256_s27 = scalar_lea.hbm %s427_s1, 256 }
  0x14   :  { %s27_s24 = sshll.u32 %s309_s23, 4  ;;  %p257_p8 = scmp.ne.s32.totalorder %s427_s1, %s256_s27  ;;  %s28_s24 = int_to_ptr.vmem [resolvable:$true] %s27_s24 }
  0x15   :  { %p260_p9 = scmp.lt.u32.totalorder %s256_s27, %s427_s1 }
  0x17   :  { %p262_p10 = pnand %p260_p9, %p257_p8 }
  0x19   :  { %265 = shalt.err (!%p262_p10)
}
  0x1a   :  { %s266_s4 = scalar_lea.vmem %s28_s24, 256  ;;  %p271_p12 = scmp.lt.s32.totalorder %s28_s24, %s28_s24 }
  0x1b   :  { %p267_p11 = scmp.ne.s32.totalorder %s28_s24, %s266_s4  ;;  %p272_p13 = scmp.lt.s32.totalorder %s266_s4, %s266_s4 }
  0x1d   :  { %p273_p0 = por %p272_p13, %p271_p12 }
  0x1f   :  { %p274_p1 = pnand %p273_p0, %p267_p11 }
  0x21   :  { %277 = shalt.err (!%p274_p1)
}
  0x22   :  { %33 = dma.hbm_to_vmem [thread:$0]  %s427_s1, 256, %s28_s24, [#allocation6], %s307_s19, %s307_s19, %s308_s20  }
  0x23   :  { %300 = dma.done.wait [#allocation3], 256  }
  0x24   :  { %301 = vsyncadd [#allocation3], 4294967040 }
  0x25   :  { %302 = dma.done.wait [#allocation6], 256  }
  0x26   :  { %303 = vsyncadd [#allocation6], 4294967040  ;;  %v40_v0 = vld [vmem:[#allocation2] sm:$0xff]  ;;  %v41_v1 = vld [vmem:[#allocation2 + $0x8] sm:$0xff]  ;;  %s310_s6 = smov 1   ;;  %s311_s7 = smov 127   ;;  %v74_v12 = vlaneseq }
  0x27   :  { %v60_v2 = vfloor.f32 %v40_v0  ;;  %v61_v3 = vfloor.f32 %v41_v1  ;;  %v43_v4 = vld [vmem:[#allocation5 + $0x8] sm:$0xff]  ;;  %v42_v5 = vld [vmem:[#allocation5] sm:$0xff]  ;;  %s313_s1 = smov [#allocation7]  }
  0x28   :  { %v121_v6 = vfloor.f32 %v43_v4  ;;  %v120_v7 = vfloor.f32 %v42_v5  ;;  %v44_v8 = vsub.f32 %v40_v0, %v42_v5  ;;  %v45_v10 = vsub.f32 %v41_v1, %v43_v4  ;;  %s216_s8 = sshll.u32 %s313_s1, 4  ;;  %s217_s8 = int_to_ptr.vmem [resolvable:$true] %s216_s8 }
  0x29   :  { %66 = vrot.lane.b32.xlu1 %v60_v2, %s310_s6  ;;  %62 = vrot.lane.b32.xlu0 %v60_v2, %s311_s7  ;;  %v362_v13 = vshrl.u32 %v74_v12, 7  ;;  %v72_v14 = vrot.slane %v60_v2, 1  ;;  %v73_v15 = vrot.slane %v61_v3, 1  ;;  %v79_v16 = vrot.slane %v60_v2, 7  ;;  %s278_s9 = scalar_lea.vmem %s217_s8, 16  ;;  %s282_s10 = scalar_lea.vmem %s217_s8, 32 }
  0x2a   :  { %v46_v9 = vmul.f32 %v44_v8, %v44_v8  ;;  %v47_v11 = vmul.f32 %v45_v10, %v45_v10  ;;  %v80_v17 = vrot.slane %v61_v3, 7  ;;  %v132_v19 = vrot.slane %v120_v7, 1  ;;  %p279_p2 = scmp.ne.s32.totalorder %s217_s8, %s278_s9  ;;  %p283_p3 = scmp.lt.s32.totalorder %s217_s8, %s217_s8 }
  0x2b   :  { %vm76_vm0 = vcmp.lt.s32.totalorder %v362_v13, 7  ;;  %vm81_vm1 = vcmp.lt.s32.totalorder %v362_v13, 1  ;;  %v133_v20 = vrot.slane %v121_v6, 1  ;;  %v136_v21 = vrot.slane %v120_v7, 7  ;;  %p284_p4 = scmp.lt.s32.totalorder %s282_s10, %s278_s9 }
  0x2c   :  { %v77_v18 = vsel %vm76_vm0, %v72_v14, %v73_v15  ;;  %v83_v22 = vsel %vm81_vm1, %v80_v17, %v79_v16  ;;  %v137_v23 = vrot.slane %v121_v6, 7  ;;  %v78_v24 = vsel %vm76_vm0, %v73_v15, %v72_v14 }
  0x2d   :  { %68 = vrot.lane.b32.xlu1 %v61_v3, %s310_s6  ;;  %64 = vrot.lane.b32.xlu0 %v61_v3, %s311_s7  ;;  %v82_v25 = vsel %vm81_vm1, %v79_v16, %v80_v17  ;;  %v84_v26 = vsub.f32 %v77_v18, %v83_v22  ;;  %v134_v28 = vsel %vm76_vm0, %v132_v19, %v133_v20  ;;  %vm185_vm2 = vcmp.gt.s32.totalorder %v362_v13, 0  ;;  %p285_p5 = por %p284_p4, %p283_p3 }
  0x2e   :  { %v85_v27 = vsub.f32 %v78_v24, %v82_v25  ;;  %v139_v29 = vsel %vm81_vm1, %v137_v23, %v136_v21  ;;  %v135_v30 = vsel %vm76_vm0, %v133_v20, %v132_v19  ;;  %v138_v31 = vsel %vm81_vm1, %v136_v21, %v137_v23 }
  0x2f   :  { %v140_v32 = vsub.f32 %v134_v28, %v139_v29  ;;  %v141_v33 = vsub.f32 %v135_v30, %v138_v31  ;;  %v104_v52 = vmul.f32 2.0, %v84_v26  ;;  %v184_v19 = vand.u32 127, %v74_v12  ;;  %p286_p6 = pnand %p285_p5, %p279_p2 }
  0x30   :  { %v182_v20 = vadd.s32 8, %v362_v13  ;;  %v312_v13 = vmov 0.0  }
  0x31   :  { %124 = vrot.lane.b32.xlu1 %v121_v6, %s311_s7  ;;  %122 = vrot.lane.b32.xlu0 %v120_v7, %s311_s7  ;;  %v160_v61 = vmul.f32 2.0, %v140_v32  ;;  %v161_v25 = vmul.f32 2.0, %v141_v33  ;;  %vm191_vm3 = vcmp.gt.s32.totalorder %v184_v19, 0  ;;  %vm194_vm6 = vcmp.lt.s32.totalorder %v184_v19, 127 }
  0x32   :  { %vm188_vm4 = vcmp.lt.s32.totalorder %v182_v20, 15  ;;  %vm192_vm5 = vmand %vm185_vm2, %vm191_vm3 }
  0x33   :  { %vm193_vm9 = vmand %vm188_vm4, %vm191_vm3 }
  0x34   :  { %vm195_vm11 = vmand %vm192_vm5, %vm194_vm6 }
  0x35   :  { %128 = vrot.lane.b32.xlu1 %v121_v6, %s310_s6  ;;  %126 = vrot.lane.b32.xlu0 %v120_v7, %s310_s6  ;;  %v105_v7 = vmul.f32 2.0, %v85_v27  ;;  %vm196_vm12 = vmand %vm193_vm9, %vm194_vm6 }
  0x54   :  { %48 = vadd.xlane.f32.xlu0 %v46_v9 }
  0x59   :  { %50 = vadd.xlane.f32.xlu1 %v47_v11 }
  0x6a   :  { %100 = vrot.lane.b32.xlu0 %v84_v26, %s310_s6  ;;  %102 = vrot.lane.b32.xlu1 %v85_v27, %s310_s6 }
  0x6e   :  { %156 = vrot.lane.b32.xlu0 %v140_v32, %s310_s6  ;;  %158 = vrot.lane.b32.xlu1 %v141_v33, %s310_s6 }
  0x72   :  { %108 = vrot.lane.b32.xlu0 %v84_v26, %s311_s7  ;;  %110 = vrot.lane.b32.xlu1 %v85_v27, %s311_s7 }
  0x76   :  { %164 = vrot.lane.b32.xlu0 %v140_v32, %s311_s7  ;;  %166 = vrot.lane.b32.xlu1 %v141_v33, %s311_s7 }
  0x9b   :  { %v63_v34 = vpop.permute.xlu0 %62  ;;  %v67_v35 = vpop.permute.xlu1 %66 }
  0x9c   :  { %v70_v43 = vsub.f32 %v63_v34, %v67_v35 }
  0x9e   :  { %v86_v48 = vrot.slane %v70_v43, 7  ;;  %v90_v55 = vmul.f32 2.0, %v70_v43  ;;  %v94_v0 = vrot.slane %v70_v43, 1 }
  0x9f   :  { %v65_v36 = vpop.permute.xlu0 %64  ;;  %v69_v37 = vpop.permute.xlu1 %68 }
  0xa0   :  { %v71_v42 = vsub.f32 %v65_v36, %v69_v37 }
  0xa2   :  { %v87_v47 = vrot.slane %v71_v42, 7  ;;  %v95_v57 = vrot.slane %v71_v42, 1  ;;  %v91_v1 = vmul.f32 2.0, %v71_v42 }
  0xa3   :  { %v123_v38 = vpop.permute.xlu0 %122  ;;  %v125_v39 = vpop.permute.xlu1 %124 }
  0xa4   :  { %v89_v54 = vsel %vm81_vm1, %v87_v47, %v86_v48  ;;  %v88_v4 = vsel %vm81_vm1, %v86_v48, %v87_v47  ;;  %v96_v8 = vsel %vm76_vm0, %v94_v0, %v95_v57  ;;  %v97_v30 = vsel %vm76_vm0, %v95_v57, %v94_v0 }
  0xa5   :  { %v92_v63 = vadd.f32 %v90_v55, %v89_v54  ;;  %v93_v17 = vadd.f32 %v91_v1, %v88_v4 }
  0xa7   :  { %v127_v40 = vpop.permute.xlu0 %126  ;;  %v129_v41 = vpop.permute.xlu1 %128  ;;  %v98_v11 = vadd.f32 %v96_v8, %v92_v63  ;;  %v99_v32 = vadd.f32 %v97_v30, %v93_v17 }
  0xa8   :  { %v131_v44 = vsub.f32 %v125_v39, %v129_v41  ;;  %v130_v45 = vsub.f32 %v123_v38, %v127_v40 }
  0xa9   :  { %v114_v28 = vand.u32 2147483647, %v98_v11  ;;  %v115_v43 = vand.u32 2147483647, %v99_v32 }
  0xaa   :  { %v143_v49 = vrot.slane %v131_v44, 7  ;;  %v142_v50 = vrot.slane %v130_v45, 7  ;;  %v146_v56 = vmul.f32 2.0, %v130_v45  ;;  %v151_v2 = vrot.slane %v131_v44, 1 }
  0xab   :  { %v150_v3 = vrot.slane %v130_v45, 1  ;;  %v147_v6 = vmul.f32 2.0, %v131_v44 }
  0xac   :  { %v145_v58 = vsel %vm81_vm1, %v143_v49, %v142_v50  ;;  %v144_v16 = vsel %vm81_vm1, %v142_v50, %v143_v49 }
  0xad   :  { %v148_v5 = vadd.f32 %v146_v56, %v145_v58  ;;  %v152_v18 = vsel %vm76_vm0, %v150_v3, %v151_v2  ;;  %v149_v27 = vadd.f32 %v147_v6, %v144_v16  ;;  %v153_v33 = vsel %vm76_vm0, %v151_v2, %v150_v3 }
  0xaf   :  { %v154_v22 = vadd.f32 %v152_v18, %v148_v5  ;;  %v155_v40 = vadd.f32 %v153_v33, %v149_v27 }
  0xb1   :  { %v170_v35 = vand.u32 2147483647, %v154_v22  ;;  %v171_v47 = vand.u32 2147483647, %v155_v40 }
  0xe1   :  { %v49_v46 = vpop.xlane.xlu0 %48 }
  0xe5   :  { %v101_v51 = vpop.permute.xlu0 %100 }
  0xe6   :  { %v51_v53 = vpop.xlane.xlu1 %50  ;;  %v106_v60 = vadd.f32 %v104_v52, %v101_v51 }
  0xe7   :  { %v52_v23 = vadd.f32 %v51_v53, %v49_v46 }
  0xe9   :  { %v157_v59 = vpop.permute.xlu0 %156  ;;  %v53_v37 = vrot.slane %v52_v23, 4 }
  0xea   :  { %v103_v62 = vpop.permute.xlu1 %102  ;;  %v162_v10 = vadd.f32 %v160_v61, %v157_v59 }
  0xeb   :  { %v107_v24 = vadd.f32 %v105_v7, %v103_v62  ;;  %v54_v45 = vadd.f32 %v53_v37, %v52_v23 }
  0xed   :  { %v109_v9 = vpop.permute.xlu0 %108  ;;  %v55_v50 = vrot.slane %v54_v45, 2 }
  0xee   :  { %v112_v14 = vadd.f32 %v109_v9, %v106_v60  ;;  %v159_v15 = vpop.permute.xlu1 %158 }
  0xef   :  { %v163_v38 = vadd.f32 %v161_v25, %v159_v15  ;;  %v56_v53 = vadd.f32 %v55_v50, %v54_v45 }
  0xf0   :  { %v116_v21 = vand.u32 2147483647, %v112_v14 }
  0xf1   :  { %v165_v26 = vpop.permute.xlu0 %164  ;;  %v57_v56 = vrot.slane %v56_v53, 1 }
  0xf2   :  { %v168_v29 = vadd.f32 %v165_v26, %v162_v10  ;;  %v111_v31 = vpop.permute.xlu1 %110  ;;  %v118_v34 = vadd.f32 %v116_v21, %v114_v28 }
  0xf3   :  { %v113_v12 = vadd.f32 %v111_v31, %v107_v24  ;;  %v58_v59 = vadd.f32 %v57_v56, %v56_v53 }
  0xf4   :  { %v172_v36 = vand.u32 2147483647, %v168_v29  ;;  %vm176_vm7 = vcmp.ge.f32.partialorder %v118_v34, 150.0 }
  0xf5   :  { %v117_v39 = vand.u32 2147483647, %v113_v12  ;;  %v59_v62 = vmul.f32 0.00048828125, %v58_v59 }
  0xf6   :  { %v174_v41 = vadd.f32 %v172_v36, %v170_v35  ;;  %v167_v42 = vpop.permute.xlu1 %166 }
  0xf7   :  { %v169_v44 = vadd.f32 %v167_v42, %v163_v38  ;;  %v119_v46 = vadd.f32 %v117_v39, %v115_v43 }
  0xf8   :  { %vm178_vm8 = vcmp.ge.f32.partialorder %v174_v41, 150.0 }
  0xf9   :  { %vm180_vm10 = vmxor %vm176_vm7, %vm178_vm8  ;;  %v173_v48 = vand.u32 2147483647, %v169_v44  ;;  %vm177_vm14 = vcmp.ge.f32.partialorder %v119_v46, 150.0 }
  0xfa   :  { %vm197_vm13 = vmand %vm180_vm10, %vm195_vm11 }
  0xfb   :  { %v175_v49 = vadd.f32 %v173_v48, %v171_v47  ;;  %v199_v51 = vsel %vm197_vm13, 1.0, %v312_v13 }
  0xfd   :  { %vm179_vm15 = vcmp.ge.f32.partialorder %v175_v49, 150.0 }
  0xfe   :  { %vm181_vm0 = vmxor %vm177_vm14, %vm179_vm15 }
  0xff   :  { %vm198_vm1 = vmand %vm181_vm0, %vm196_vm12 }
 0x100   :  { %v200_v52 = vsel %vm198_vm1, 1.0, %v312_v13 }
 0x101   :  { %v201_v54 = vadd.f32 %v200_v52, %v199_v51 }
 0x103   :  { %v202_v55 = vrot.slane %v201_v54, 4 }
 0x105   :  { %v203_v57 = vadd.f32 %v202_v55, %v201_v54 }
 0x107   :  { %v204_v58 = vrot.slane %v203_v57, 2 }
 0x109   :  { %v205_v60 = vadd.f32 %v204_v58, %v203_v57 }
 0x10b   :  { %v206_v61 = vrot.slane %v205_v60, 1 }
 0x10d   :  { %v207_v63 = vadd.f32 %v206_v61, %v205_v60 }
 0x10f   :  { %v208_v0 = vadd.f32 %v207_v63, %v59_v62 }
 0x111   :  { %209 = vst [vmem:[#allocation7] sm:$0x1] %v208_v0 }
 0x112   :  { %289 = shalt.err (!%p286_p6)
}
 0x113   :  { %s290_s13 = scalar_lea.hbm %s428_s2, 16 }
 0x114   :  { %p291_p7 = scmp.ne.s32.totalorder %s428_s2, %s290_s13  ;;  %p294_p8 = scmp.lt.u32.totalorder %s290_s13, %s428_s2 }
 0x116   :  { %p296_p9 = pnand %p294_p8, %p291_p7 }
 0x118   :  { %299 = shalt.err (!%p296_p9)
}
 0x119   :  { %219 = dma.vmem_to_hbm [thread:$0]  %s217_s8, 16, %s428_s2, [#allocation4]  }
 0x11a   :  { %304 = dma.done.wait [#allocation4], 16  }
 0x11b   :  { %305 = vsyncadd [#allocation4], 4294967280 }
 0x11c   :  { %223 = vsyncpa [#allocation3], 1 }
 0x11d   :  { %224 = vsyncpa [#allocation6], 1 }
 0x11e   :  { %225 = vsyncpa [#allocation4], 1 }

</bundles_post_ra>
